<compile_context>
chip_gen: v7x
topology: tpu7x:2x2x1
jax: 0.10.0
libtpu: 0.0.40
codegen_flags: <defaults>
</compile_context>

<pallas_src>
import functools

import jax
import jax.numpy as jnp
from jax.experimental import pallas as pl
from jax.experimental.pallas import tpu as pltpu


def _prefix_copy_kernel(n_dst, src_ref, dst_ref, sem):
    # src_ref: full [N, D] array left in HBM (memory_space=pl.ANY).
    # dst_ref: [n_dst, D] output, also in HBM.
    # The first n_dst rows are one contiguous byte range -> one DMA descriptor.
    cp = pltpu.make_async_copy(src_ref.at[pl.ds(0, n_dst)], dst_ref, sem)
    cp.start()
    cp.wait()


@functools.partial(jax.jit, static_argnames=("n_dst",))
def _prefix_copy(feat, n_dst):
    n, d = feat.shape
    itemsize = jnp.dtype(feat.dtype).itemsize
    return pl.pallas_call(
        functools.partial(_prefix_copy_kernel, n_dst),
        out_shape=jax.ShapeDtypeStruct((n_dst, d), feat.dtype),
        # No grid / no BlockSpec tiling: both refs stay in HBM, the kernel body
        # issues a single direct HBM->HBM DMA of the contiguous prefix.
        in_specs=[pl.BlockSpec(memory_space=pl.ANY)],
        out_specs=pl.BlockSpec(memory_space=pl.ANY),
        scratch_shapes=[pltpu.SemaphoreType.DMA],
        cost_estimate=pl.CostEstimate(
            flops=0,
            transcendentals=0,
            bytes_accessed=2 * n_dst * d * itemsize,
        ),
    )(feat)


def identity_conv(feat, num_dst_nodes=None):
    """Pallas IdentityConv.forward.

    feat: [N, D] node features.
    num_dst_nodes: None for a plain graph (returns feat unchanged, no kernel);
      for a DGL block graph pass the (static) number of destination nodes and
      the contiguous row prefix feat[:num_dst_nodes] is produced by a single
      HBM->HBM DMA inside a Pallas kernel.
    """
    n, _ = feat.shape
    if num_dst_nodes is None or int(num_dst_nodes) >= n:
        # Pure identity: do not launch a kernel, do not touch HBM.
        return feat
    return _prefix_copy(feat, int(num_dst_nodes))


def identity_conv_block(feat, num_dst_nodes):
    """Block-graph variant: feat_dst = feat[:num_dst_nodes]."""
    return identity_conv(feat, num_dst_nodes=num_dst_nodes)


if __name__ == "__main__":
    key = jax.random.PRNGKey(0)
    k1, k2, k3 = jax.random.split(key, 3)

    # 1) Plain-graph identity path: 16 nodes, 128-dim features (f32).
    N, D = 16, 128
    feat = jax.random.normal(k1, (N, D), dtype=jnp.float32)
    out = jax.block_until_ready(identity_conv(feat))
    assert out.shape == feat.shape and out.dtype == feat.dtype
    assert bool(jnp.array_equal(out, feat))

    # 2) Block-graph path: feat_dst = feat[:8] via a single HBM->HBM DMA.
    out_blk = jax.block_until_ready(identity_conv_block(feat, 8))
    assert out_blk.shape == (8, D) and out_blk.dtype == feat.dtype
    assert bool(jnp.array_equal(out_blk, feat[:8]))

    # 3) Ragged rows + non-multiple-of-8 prefix (still one contiguous DMA).
    feat_rag = jax.random.normal(k2, (20, 256), dtype=jnp.float32)
    out_rag = jax.block_until_ready(identity_conv_block(feat_rag, 13))
    assert out_rag.shape == (13, 256)
    assert bool(jnp.array_equal(out_rag, feat_rag[:13]))

    # 4) bf16 with a feature dim that is NOT a multiple of 128 — fine for the
    #    DMA path (byte copy; no lane-density concerns).
    feat_bf16 = jax.random.normal(k3, (24, 96), dtype=jnp.bfloat16)
    out_bf16 = jax.block_until_ready(identity_conv_block(feat_bf16, 10))
    assert out_bf16.shape == (10, 96) and out_bf16.dtype == jnp.bfloat16
    assert bool(jnp.array_equal(out_bf16, feat_bf16[:10]))

    print("KERNEL_OK")
</pallas_src>

<mosaic_0001>
module attributes {stable_mosaic.version = 11 : i64} {
  func.func @_prefix_copy_kernel(%arg0: memref<16x128xf32, #tpu.memory_space<any>>, %arg1: memref<8x128xf32, #tpu.memory_space<any>>, %arg2: memref<!tpu.dma_semaphore, #tpu.memory_space<semaphore_mem>>) attributes {dimension_semantics = [], scalar_prefetch = 0 : i64, scratch_operands = 1 : i64, tpu.core_type = #tpu.core_type<tc>} {
    %c0_i32 = arith.constant 0 : i32
    %c0_i32_0 = arith.constant 0 : i32
    %0 = tpu.memref_slice %arg0[%c0_i32, %c0_i32_0] : memref<16x128xf32, #tpu.memory_space<any>> -> memref<8x128xf32, #tpu.memory_space<any>>
    tpu.enqueue_dma source(%0 : memref<8x128xf32, #tpu.memory_space<any>>) target(%arg1 : memref<8x128xf32, #tpu.memory_space<any>>) target_semaphore(%arg2 : memref<!tpu.dma_semaphore, #tpu.memory_space<semaphore_mem>>)
    %c0_i32_1 = arith.constant 0 : i32
    %c0_i32_2 = arith.constant 0 : i32
    %1 = tpu.memref_slice %arg0[%c0_i32_1, %c0_i32_2] : memref<16x128xf32, #tpu.memory_space<any>> -> memref<8x128xf32, #tpu.memory_space<any>>
    tpu.wait_dma2 semaphore(%arg2 : memref<!tpu.dma_semaphore, #tpu.memory_space<semaphore_mem>>) src(%1 : memref<8x128xf32, #tpu.memory_space<any>>) dst(%arg1 : memref<8x128xf32, #tpu.memory_space<any>>)
    return
  }
}

</mosaic_0001>

<bundles_post_ra>
// kernel: _prefix_copy.1
= control target key start
LH: loop header
LB: loop body
LE: loop exit
PB: predicated region body
PF: predicated region fallthrough
CT: control target
= control target key end

     0   :  { %s34_s6 = smov [#allocation2]   ;;  %s35_s7 = smov [#allocation3]   ;;  %s53_s0 = inlined_call_operand.hbm [shape: f32[16,128], index: 0, kind: input, shape index: {}]   ;;  %s54_s1 = inlined_call_operand.hbm [shape: f32[8,128], index: 1, kind: output, shape index: {}]  }
   0x1   :  { %s36_s8 = smov 0  }
   0x2   :  { %18 = dma.general %s53_s0, 128, %s54_s1, %s34_s6, %s35_s7, [#allocation4], %s36_s8, 0  }
   0x3   :  { %32 = dma.done.wait [#allocation2], 128 }
   0x4   :  { %33 = vsyncadd [#allocation2], 4294967168 }
   0x5   :  { %22 = vsyncmov [#allocation2] }
   0x8   :  { %s23_s13 = vpop.sfrf %22 }
   0x9   :  { %p28_p0 = scmp.ne.s32.totalorder %s23_s13, 0 }
   0xb   :  { %27 = shalt.err (%p28_p0)  }

</bundles_post_ra>
